<compile_context>
chip_gen: v7x
topology: tpu7x:2x2x1
jax: 0.10.0
libtpu: 0.0.40
codegen_flags: <defaults>
</compile_context>

<pallas_src>
import jax
import jax.numpy as jnp
from jax import lax
from jax.experimental import pallas as pl
from jax.experimental.pallas import tpu as pltpu

# Problem sizes (small, consistent with Conv2d(1, 6, 5))
N, CIN, H, W = 2, 1, 16, 16
COUT, K = 6, 5
OH, OW = H - K + 1, W - K + 1      # 12, 12


def gemm_relu_kernel(w_ref, p_ref, o_ref):
    """out = relu(W @ patches); bias is folded into tap column 25 of W.

    w_ref : (COUT_PAD, KKP)  bf16 VMEM -- conv weights + bias as a tap matrix
    p_ref : (KKP, P_PAD)     bf16 VMEM -- im2col patches (+ ones row for bias)
    o_ref : (COUT_PAD, P_PAD) f32 VMEM -- lane-dense, (8,128)-aligned output
    """
    acc = jnp.dot(w_ref[...], p_ref[...], preferred_element_type=jnp.float32)
    o_ref[...] = jnp.maximum(acc, 0.0)          # f32 epilogue (v5e-safe)


def conv2d_relu_pallas(x, w, b):
    """x: (N,1,H,W) f32, w: (COUT,1,K,K) f32, b: (COUT,) f32 -> (N,COUT,OH,OW)."""
    n, cin, h, wdt = x.shape
    cout, _, k, _ = w.shape
    oh, ow = h - k + 1, wdt - k + 1
    p = n * oh * ow                          # 288
    kk = k * k                               # 25 conv taps
    kkp = ((kk + 1 + 7) // 8) * 8            # 26 (taps + bias) -> 32
    p_pad = ((p + 127) // 128) * 128         # 288 -> 384  (3 full vregs)
    cout_pad = ((cout + 7) // 8) * 8         # 6 -> 8      (full sublanes)

    x32 = x.astype(jnp.float32)

    # ---- wrapper-side layout plumbing (no FLOPs) --------------------------
    # im2col: 25 shifted windows, ki-major / kj-minor to match w.reshape(cout,kk),
    # plus a ones-row in tap slot `kk` carrying the bias, then zero-pad taps.
    x2 = x32[:, 0]                                            # (n, h, w)
    cols = [x2[:, ki:ki + oh, kj:kj + ow].reshape(p)
            for ki in range(k) for kj in range(k)]            # kk x (p,)
    cols.append(jnp.ones((p,), jnp.float32))                  # bias tap row
    cols += [jnp.zeros((p,), jnp.float32)] * (kkp - kk - 1)   # zero-pad taps
    patches = jnp.stack(cols, axis=0)                         # (kkp, p)
    patches = jnp.pad(patches, ((0, 0), (0, p_pad - p)))      # (kkp, p_pad)
    patches_bf16 = patches.astype(jnp.bfloat16)

    # Weight pre-pack: (cout,1,k,k) -> (cout_pad, kkp); bias folded into col kk.
    w2 = jnp.zeros((cout_pad, kkp), jnp.float32)
    w2 = w2.at[:cout, :kk].set(w.reshape(cout, kk).astype(jnp.float32))
    w2 = w2.at[:cout, kk].set(b.astype(jnp.float32))
    w2_bf16 = w2.astype(jnp.bfloat16)

    # ---- single-step Pallas call (no grid) --------------------------------
    bytes_accessed = (w2_bf16.size * 2 + patches_bf16.size * 2
                      + cout_pad * p_pad * 4)
    out_flat = pl.pallas_call(
        gemm_relu_kernel,
        out_shape=jax.ShapeDtypeStruct((cout_pad, p_pad), jnp.float32),
        in_specs=[
            pl.BlockSpec(memory_space=pltpu.MemorySpace.VMEM),  # weights+bias
            pl.BlockSpec(memory_space=pltpu.MemorySpace.VMEM),  # im2col patches
        ],
        out_specs=pl.BlockSpec(memory_space=pltpu.MemorySpace.VMEM),
        compiler_params=pltpu.CompilerParams(
            allow_input_fusion=[False, True]),  # fuse im2col producer in
        cost_estimate=pl.CostEstimate(
            flops=2 * cout_pad * kkp * p_pad,
            transcendentals=0,
            bytes_accessed=bytes_accessed),
    )(w2_bf16, patches_bf16)                                  # (cout_pad, p_pad)

    # Slice off padding + un-flatten back to NCHW (layout plumbing only).
    out = out_flat[:cout, :p].reshape(cout, n, oh, ow)
    return out.transpose(1, 0, 2, 3)


def conv2d_relu_ref(x, w, b):
    out = lax.conv_general_dilated(
        x, w, window_strides=(1, 1), padding="VALID",
        dimension_numbers=("NCHW", "OIHW", "NCHW"))
    return jnp.maximum(out + b[None, :, None, None], 0.0)


if __name__ == "__main__":
    key = jax.random.PRNGKey(0)
    kx, kw, kb = jax.random.split(key, 3)

    # Deterministic parameter init (PyTorch-like uniform(-1/sqrt(fan_in), +)).
    fan_in = CIN * K * K
    bound = 1.0 / (fan_in ** 0.5)
    w = jax.random.uniform(kw, (COUT, CIN, K, K), jnp.float32, -bound, bound)
    b = jax.random.uniform(kb, (COUT,), jnp.float32, -bound, bound)
    x = jax.random.normal(kx, (N, CIN, H, W), jnp.float32)

    out = conv2d_relu_pallas(x, w, b)
    out = jax.block_until_ready(out)

    ref = conv2d_relu_ref(x, w, b)
    assert out.shape == (N, COUT, OH, OW)
    # bf16 MXU operands with f32 accumulation vs f32 XLA conv reference:
    # tolerance loosened per the perf review.
    assert jnp.allclose(out, ref, atol=1e-2, rtol=1e-2), "mismatch vs reference"

    # TODO(synk): PyTorch forward() has no `return` (returns None); we return
    # c1 = relu(conv1(x)), the only computation the module performs.
    print("KERNEL_OK")
</pallas_src>

<mosaic_0001>
module attributes {stable_mosaic.version = 11 : i64} {
  func.func @gemm_relu_kernel(%arg0: memref<8x32xbf16, #tpu.memory_space<vmem>>, %arg1: memref<32x384xbf16, #tpu.memory_space<vmem>>, %arg2: memref<8x384xf32, #tpu.memory_space<vmem>>) attributes {dimension_semantics = [], scalar_prefetch = 0 : i64, scratch_operands = 0 : i64, tpu.core_type = #tpu.core_type<tc>} {
    %c0 = arith.constant 0 : index
    %c0_0 = arith.constant 0 : index
    %0 = vector.load %arg0[%c0, %c0_0] : memref<8x32xbf16, #tpu.memory_space<vmem>>, vector<8x32xbf16>
    %c0_1 = arith.constant 0 : index
    %c0_2 = arith.constant 0 : index
    %1 = vector.load %arg1[%c0_1, %c0_2] : memref<32x384xbf16, #tpu.memory_space<vmem>>, vector<32x384xbf16>
    %cst = arith.constant dense<0.000000e+00> : vector<8x384xf32>
    %2 = tpu.matmul %0, %1, %cst {dimension_numbers = #tpu.dot_dimension_numbers<[1], [0], [0], [1], [0, 0, 1, 1], [], []>} : vector<8x32xbf16>, vector<32x384xbf16>, vector<8x384xf32> -> vector<8x384xf32>
    %cst_3 = arith.constant 0.000000e+00 : f32
    %3 = vector.broadcast %cst_3 : f32 to vector<8x384xf32>
    %4 = arith.maximumf %2, %3 : vector<8x384xf32>
    %c0_4 = arith.constant 0 : index
    %c0_5 = arith.constant 0 : index
    %5 = vector.load %arg2[%c0_4, %c0_5] : memref<8x384xf32, #tpu.memory_space<vmem>>, vector<8x384xf32>
    tpu.vector_store %arg2[%c0_4, %c0_5], %4 {strides = array<i32>} : memref<8x384xf32, #tpu.memory_space<vmem>>, vector<8x384xf32>,
    return
  }
}

</mosaic_0001>

<bundles_post_ra>
// kernel: tpu_custom_call.1
= control target key start
LH: loop header
LB: loop body
LE: loop exit
PB: predicated region body
PF: predicated region fallthrough
CT: control target
= control target key end

     0   :  { %7 = vsyncpa [#allocation3], 0  ;;  %s360_s0 = inlined_call_operand.hbm [shape: bf16[8,32], index: 0, kind: input, shape index: {}]   ;;  %s361_s1 = inlined_call_operand.hbm [shape: bf16[32,384], index: 1, kind: input, shape index: {}]   ;;  %s362_s2 = inlined_call_operand.hbm [shape: f32[8,384], index: 2, kind: output, shape index: {}]  }
   0x1   :  { %8 = vsyncpa [#allocation6], 0 }
   0x2   :  { %9 = vsyncpa [#allocation4], 0  ;;  %s294_s9 = smov [#allocation2]   ;;  %s295_s11 = smov [#allocation5]  }
   0x3   :  { %s16_s10 = sshll.u32 %s294_s9, 4  ;;  %s25_s12 = sshll.u32 %s295_s11, 4  ;;  %s17_s10 = int_to_ptr.vmem [resolvable:$true] %s16_s10  ;;  %s317_s12 = int_to_ptr.vmem [resolvable:$true] %s25_s12 }
   0x4   :  { %s222_s15 = scalar_lea.hbm %s360_s0, 64 }
   0x5   :  { %p223_p0 = scmp.ne.s32.totalorder %s360_s0, %s222_s15  ;;  %p226_p1 = scmp.lt.u32.totalorder %s222_s15, %s360_s0 }
   0x7   :  { %p228_p2 = pnand %p226_p1, %p223_p0 }
   0x9   :  { %231 = shalt.err (!%p228_p2)
}
   0xa   :  { %s232_s20 = scalar_lea.vmem %s17_s10, 64  ;;  %p237_p4 = scmp.lt.s32.totalorder %s17_s10, %s17_s10 }
   0xb   :  { %p233_p3 = scmp.ne.s32.totalorder %s17_s10, %s232_s20  ;;  %p238_p5 = scmp.lt.s32.totalorder %s232_s20, %s232_s20 }
   0xd   :  { %p239_p6 = por %p238_p5, %p237_p4 }
   0xf   :  { %p240_p7 = pnand %p239_p6, %p233_p3 }
  0x11   :  { %243 = shalt.err (!%p240_p7)
}
  0x12   :  { %19 = dma.hbm_to_vmem [thread:$0]  %s360_s0, 64, %s17_s10, [#allocation3]  }
  0x13   :  { %s244_s25 = scalar_lea.hbm %s361_s1, 768 }
  0x14   :  { %p245_p8 = scmp.ne.s32.totalorder %s361_s1, %s244_s25  ;;  %p248_p9 = scmp.lt.u32.totalorder %s244_s25, %s361_s1 }
  0x16   :  { %p250_p10 = pnand %p248_p9, %p245_p8 }
  0x18   :  { %253 = shalt.err (!%p250_p10)
}
  0x19   :  { %s254_s30 = scalar_lea.vmem %s317_s12, 768  ;;  %p259_p12 = scmp.lt.s32.totalorder %s317_s12, %s317_s12 }
  0x1a   :  { %p255_p11 = scmp.ne.s32.totalorder %s317_s12, %s254_s30  ;;  %p260_p13 = scmp.lt.s32.totalorder %s254_s30, %s254_s30 }
  0x1c   :  { %p261_p0 = por %p260_p13, %p259_p12 }
  0x1e   :  { %p262_p1 = pnand %p261_p0, %p255_p11 }
  0x20   :  { %265 = shalt.err (!%p262_p1)
}
  0x21   :  { %s296_s0 = smov 192   ;;  %s297_s3 = smov 12  }
  0x22   :  { %31 = dma.hbm_to_vmem [thread:$0]  %s361_s1, 768, %s317_s12, [#allocation6], %s296_s0, %s296_s0, %s297_s3  }
  0x23   :  { %288 = dma.done.wait [#allocation3], 64  }
  0x24   :  { %289 = vsyncadd [#allocation3], 4294967232 }
  0x25   :  { %290 = dma.done.wait [#allocation6], 768  }
  0x26   :  { %291 = vsyncadd [#allocation6], 4294966528  ;;  %v298_v0 = vmov 0.0   ;;  %vm299_vm0 = vmmov 0   ;;  %v300_v1 = vmov 0   ;;  %vm80_vm1 = vcmask 261120  }
  0x27   :  { %198 = vmatprep.subr.bf16.mxu1 %v298_v0  ;;  %202 = vmatprep.mubr.msk.bf16.mxu1 %vm299_vm0, %v298_v0  ;;  %v214_v2 = vld [vmem:[#allocation5 + $0x4] ss:$12 sps:$4 sm:$0xff]   ;;  %v216_v3 = vld [vmem:[#allocation5 + $0x8] ss:$12 sps:$4 sm:$0xff]   ;;  %v217_v4 = vld [vmem:[#allocation5] ss:$12 sps:$4 sm:$0xff]  }
  0x28   :  { %116 = vmatprep.mubr.bf16.mxu0 %v300_v1  ;;  %84 = vmatprep.subr.bf16.mxu0 %v214_v2  ;;  %v218_v5 = vld [vmem:[#allocation5 + $0x1c] ss:$12 sps:$4 sm:$0xff]   ;;  %v220_v6 = vld [vmem:[#allocation5 + $0x20] ss:$12 sps:$4 sm:$0xff]   ;;  %v221_v7 = vld [vmem:[#allocation5 + $0x18] ss:$12 sps:$4 sm:$0xff]  }
  0x29   :  { %199 = vmatpush3.bf16.msra.mxu1 %v216_v3  ;;  %85 = vmatpush1.bf16.msra.mxu0 %v217_v4  ;;  %v39_v8 = vld [vmem:[#allocation2] sm:$0xf]  ;;  %s301_s1 = smov [#allocation7]  }
  0x2a   :  { %200 = vmatprep.subr.bf16.mxu1 %v298_v0  ;;  %86 = vmatprep.subr.bf16.mxu0 %v218_v5  ;;  %s177_s6 = sshll.u32 %s301_s1, 4  ;;  %s178_s6 = int_to_ptr.vmem [resolvable:$true] %s177_s6 }
  0x2b   :  { %s266_s7 = scalar_lea.vmem %s178_s6, 384  ;;  %p271_p3 = scmp.lt.s32.totalorder %s178_s6, %s178_s6 }
  0x2c   :  { %p267_p2 = scmp.ne.s32.totalorder %s178_s6, %s266_s7  ;;  %p272_p4 = scmp.lt.s32.totalorder %s266_s7, %s266_s7 }
  0x2d   :  { %201 = vmatpush3.bf16.msra.mxu1 %v220_v6  ;;  %87 = vmatpush1.bf16.msra.mxu0 %v221_v7 }
  0x2e   :  { %p273_p5 = por %p272_p4, %p271_p3 }
  0x30   :  { %203 = vmatmul.mubr.msk.bf16.vlgmr.msra.gmra.mrb[0].mxu1 %vm80_vm1, %v39_v8  ;;  %193 = vmatmul.mubr.msk.bf16.vlgmr.msra.gmra.mrb[0].mxu0 %vm80_vm1, %v39_v8  ;;  %p274_p6 = pnand %p273_p5, %p267_p2 }
 0x103   :  { %v159_v9 = vpop.f32.mrb[0].mxu1  ;;  %v118_v11 = vpop.f32.mrb[0].mxu0 }
 0x104   :  { %v167_v10 = vmax.f32 %v159_v9, 0.0  ;;  %v204_v12 = vpop.f32.mrb[1].mxu1  ;;  %v165_v13 = vmax.f32 %v118_v11, 0.0  ;;  %v120_v14 = vpop.f32.mrb[1].mxu0 }
 0x105   :  { %v162_v15 = vpop.f32.mrb[2].mxu1  ;;  %v166_v16 = vmax.f32 %v120_v14, 0.0  ;;  %v122_v17 = vpop.f32.mrb[2].mxu0 }
 0x106   :  { %170 = vst [vmem:[#allocation7 + $0x10] sm:$0xff] %v167_v10  ;;  %v205_v18 = vpop.f32.mrb[3].mxu1  ;;  %168 = vst [vmem:[#allocation7] sm:$0xff] %v165_v13  ;;  %v123_v19 = vpop.f32.mrb[3].mxu0 }
 0x107   :  { %169 = vst [vmem:[#allocation7 + $0x8] sm:$0xff] %v166_v16 }
 0x108   :  { %277 = shalt.err (!%p274_p6)
}
 0x109   :  { %s278_s10 = scalar_lea.hbm %s362_s2, 384 }
 0x10a   :  { %p279_p7 = scmp.ne.s32.totalorder %s362_s2, %s278_s10  ;;  %p282_p8 = scmp.lt.u32.totalorder %s278_s10, %s362_s2 }
 0x10c   :  { %p284_p9 = pnand %p282_p8, %p279_p7 }
 0x10e   :  { %287 = shalt.err (!%p284_p9)
}
 0x10f   :  { %180 = dma.vmem_to_hbm [thread:$0]  %s178_s6, 384, %s362_s2, [#allocation4]  }
 0x110   :  { %292 = dma.done.wait [#allocation4], 384  }
 0x111   :  { %293 = vsyncadd [#allocation4], 4294966912 }
 0x112   :  { %184 = vsyncpa [#allocation3], 1 }
 0x113   :  { %185 = vsyncpa [#allocation6], 1 }
 0x114   :  { %186 = vsyncpa [#allocation4], 1 }

</bundles_post_ra>
